<compile_context>
chip_gen: v7x
topology: tpu7x:2x2x1
jax: 0.10.0
libtpu: 0.0.40
codegen_flags: <defaults>
</compile_context>

<pallas_src>
import math

import jax
import jax.numpy as jnp
from jax.experimental import pallas as pl
from jax.experimental.pallas import tpu as pltpu


# ----------------------------------------------------------------------------
# Kernel
# ----------------------------------------------------------------------------
def _m_attention_kernel(pb_ref, k_ref, q_ref, wk_ref, wq_ref, pw_ref, o_ref):
    # k:[bb,N,E]  q:[bb,E]  wk,wq:[E,hd](in,out)  pw:[1,hd]  pb(SMEM):[1,1]
    # -> o:[bb,E]   (q_len == 1; the wrapper restores the [B,1,E] shape)
    k = k_ref[...]
    q = q_ref[...]
    bb, n, e = k.shape
    hd = wk_ref.shape[1]

    # Key / query projections: one MXU matmul each, sigmoid on the VPU/EUP.
    kx = jax.nn.sigmoid(
        jnp.dot(k.reshape(bb * n, e), wk_ref[...],
                preferred_element_type=jnp.float32)).reshape(bb, n, hd)
    qx = jax.nn.sigmoid(
        jnp.dot(q, wq_ref[...], preferred_element_type=jnp.float32))     # [bb, hd]

    # score[b, n] = sigmoid(<qx[b] * kx[b, n], proj_w> + proj_b)
    # Fold proj_w into the query first so the [bb, n, hd] product is formed once.
    qw = qx * pw_ref[...]                                                 # [bb, hd]
    logits = jnp.sum(kx * qw[:, None, :], axis=-1) + pb_ref[0, 0]         # [bb, n]
    score = jax.nn.sigmoid(logits) * (1.0 / math.sqrt(hd))

    # Softmax over k_len, then attend over the *raw* keys.
    score = score - jnp.max(score, axis=-1, keepdims=True)
    p = jnp.exp(score)
    p = p / jnp.sum(p, axis=-1, keepdims=True)
    o_ref[...] = jnp.sum(p[:, :, None] * k, axis=1)                       # [bb, e]


# ----------------------------------------------------------------------------
# Wrapper
# ----------------------------------------------------------------------------
def m_attention(k, q, params, *, block_b=None):
    """M_Attention forward.  k:[B,N,E], q:[B,E] (q_len==1) -> [B,1,E]."""
    if q.ndim == 3:
        # TODO(synk): general q_len > 1 (requires q_len == k_len in the
        # reference broadcast); only the q_len == 1 path used by EIMANN is implemented.
        q = q[:, 0, :]
    B, N, E = k.shape
    hd = params["w_kx"].shape[1]

    # Batch tiling: whole batch in one grid step when small; 128-row tiles
    # (multiple of 8 sublanes) when large.  Axis is "parallel" (v7x megacore).
    if block_b is None:
        block_b = 128 if (B > 128 and B % 128 == 0) else B
    assert B % block_b == 0
    grid = (B // block_b,)

    out = pl.pallas_call(
        _m_attention_kernel,
        out_shape=jax.ShapeDtypeStruct((B, E), jnp.float32),
        grid=grid,
        in_specs=[
            pl.BlockSpec(memory_space=pltpu.MemorySpace.SMEM),            # proj_b
            pl.BlockSpec((block_b, N, E), lambda i: (i, 0, 0)),           # k
            pl.BlockSpec((block_b, E), lambda i: (i, 0)),                 # q
            pl.BlockSpec((E, hd), lambda i: (0, 0)),                      # w_kx
            pl.BlockSpec((E, hd), lambda i: (0, 0)),                      # w_qx
            pl.BlockSpec((1, hd), lambda i: (0, 0)),                      # proj_w
        ],
        out_specs=pl.BlockSpec((block_b, E), lambda i: (i, 0)),
        compiler_params=pltpu.CompilerParams(
            dimension_semantics=("parallel",)),
    )(params["proj_b"], k, q, params["w_kx"], params["w_qx"], params["proj_w"])

    return out[:, None, :]   # match the PyTorch output shape [B, q_len=1, E]


# ----------------------------------------------------------------------------
# Pure-JAX reference (direct transcription of M_Attention.forward, n_head=1)
# ----------------------------------------------------------------------------
def m_attention_ref(k, q, params):
    hd = params["w_kx"].shape[1]
    hp = jax.lax.Precision.HIGHEST
    q3 = q[:, None, :]                                                    # q_len = 1
    kx = jax.nn.sigmoid(jnp.einsum("bne,eh->bnh", k, params["w_kx"], precision=hp))
    qx = jax.nn.sigmoid(jnp.einsum("bqe,eh->bqh", q3, params["w_qx"], precision=hp))
    memory = qx * kx
    score = jax.nn.sigmoid(
        jnp.einsum("bnh,h->bn", memory, params["proj_w"][0], precision=hp)
        + params["proj_b"][0, 0])
    score = jax.nn.softmax(score[:, None, :] / math.sqrt(hd), axis=-1)    # permute + scale
    return jnp.einsum("bqn,bne->bqe", score, k, precision=hp)             # dropout(p=0) = id


# ----------------------------------------------------------------------------
# Deterministic parameter init (uniform(-stdv, stdv); the PyTorch renorm trick
# is an init detail, not a forward-pass semantic)
# ----------------------------------------------------------------------------
def init_params(key, embed_dim, hidden_dim=None, n_head=1):
    if hidden_dim is None:
        hidden_dim = embed_dim // n_head
    assert n_head == 1  # the reference forward's final bmm only supports n_head == 1
    kk, kq, kpw, kpb = jax.random.split(key, 4)
    stdv = 1.0 / math.sqrt(hidden_dim)
    u = lambda k_, shape: jax.random.uniform(k_, shape, jnp.float32, -stdv, stdv)
    return dict(
        w_kx=u(kk, (embed_dim, hidden_dim)),     # PyTorch w_kx[0], already (in, out)
        w_qx=u(kq, (embed_dim, hidden_dim)),
        proj_w=u(kpw, (1, hidden_dim)),          # nn.Linear(hd, 1).weight
        proj_b=u(kpb, (1, 1)),                   # nn.Linear(hd, 1).bias -> SMEM scalar
    )


if __name__ == "__main__":
    key = jax.random.PRNGKey(0)
    kp, kk, kq = jax.random.split(key, 3)

    B, N, E = 2, 8, 32          # batch, k_len, embed_dim (Interaction_dim)
    params = init_params(kp, E)
    k = jax.random.normal(kk, (B, N, E), jnp.float32)   # keys (extracted node features)
    q = jax.random.normal(kq, (B, E), jnp.float32)      # query (2-D -> q_len = 1)

    fwd = jax.jit(m_attention)
    out = fwd(k, q, params)
    jax.block_until_ready(out)

    ref = m_attention_ref(k, q, params)
    assert out.shape == (B, 1, E) and out.dtype == jnp.float32
    assert jnp.allclose(out, ref, atol=1e-4, rtol=1e-4), \
        float(jnp.max(jnp.abs(out - ref)))
    print("KERNEL_OK")
</pallas_src>

<mosaic_0001>
module attributes {stable_mosaic.version = 11 : i64} {
  func.func @_m_attention_kernel(%arg0: i32, %arg1: memref<1x1xf32, #tpu.memory_space<smem>>, %arg2: memref<2x8x32xf32, #tpu.memory_space<vmem>>, %arg3: memref<2x32xf32, #tpu.memory_space<vmem>>, %arg4: memref<32x32xf32, #tpu.memory_space<vmem>>, %arg5: memref<32x32xf32, #tpu.memory_space<vmem>>, %arg6: memref<1x32xf32, #tpu.memory_space<vmem>>, %arg7: memref<2x32xf32, #tpu.memory_space<vmem>>) attributes {dimension_semantics = [#tpu.dimension_semantics<parallel>], iteration_bounds = array<i64: 1>, scalar_prefetch = 0 : i64, scratch_operands = 0 : i64, tpu.core_type = #tpu.core_type<tc>, window_params = [{transform_indices = @transform_0, window_bounds = array<i64: 1, 1>}, {transform_indices = @transform_1, window_bounds = array<i64: 2, 8, 32>}, {transform_indices = @transform_2, window_bounds = array<i64: 2, 32>}, {pipeline_mode = #tpu.pipeline_mode<synchronous>, transform_indices = @transform_3, window_bounds = array<i64: 32, 32>}, {pipeline_mode = #tpu.pipeline_mode<synchronous>, transform_indices = @transform_4, window_bounds = array<i64: 32, 32>}, {pipeline_mode = #tpu.pipeline_mode<synchronous>, transform_indices = @transform_5, window_bounds = array<i64: 1, 32>}, {transform_indices = @transform_6, window_bounds = array<i64: 2, 32>}]} {
    %c0 = arith.constant 0 : index
    %c0_0 = arith.constant 0 : index
    %c0_1 = arith.constant 0 : index
    %0 = vector.load %arg2[%c0, %c0_0, %c0_1] : memref<2x8x32xf32, #tpu.memory_space<vmem>>, vector<2x8x32xf32>
    %c0_2 = arith.constant 0 : index
    %c0_3 = arith.constant 0 : index
    %1 = vector.load %arg3[%c0_2, %c0_3] : memref<2x32xf32, #tpu.memory_space<vmem>>, vector<2x32xf32>
    %2 = vector.shape_cast %0 : vector<2x8x32xf32> to vector<16x32xf32>
    %c0_4 = arith.constant 0 : index
    %c0_5 = arith.constant 0 : index
    %3 = vector.load %arg4[%c0_4, %c0_5] : memref<32x32xf32, #tpu.memory_space<vmem>>, vector<32x32xf32>
    %cst = arith.constant dense<0.000000e+00> : vector<16x32xf32>
    %4 = tpu.matmul %2, %3, %cst {dimension_numbers = #tpu.dot_dimension_numbers<[1], [0], [0], [1], [0, 0, 1, 1], [], []>} : vector<16x32xf32>, vector<32x32xf32>, vector<16x32xf32> -> vector<16x32xf32>
    %5 = arith.negf %4 : vector<16x32xf32>
    %6 = math.exp %5 : vector<16x32xf32>
    %cst_6 = arith.constant 1.000000e+00 : f32
    %7 = vector.broadcast %cst_6 : f32 to vector<16x32xf32>
    %8 = arith.addf %7, %6 : vector<16x32xf32>
    %9 = arith.divf %7, %8 : vector<16x32xf32>
    %10 = vector.shape_cast %9 : vector<16x32xf32> to vector<2x8x32xf32>
    %c0_7 = arith.constant 0 : index
    %c0_8 = arith.constant 0 : index
    %11 = vector.load %arg5[%c0_7, %c0_8] : memref<32x32xf32, #tpu.memory_space<vmem>>, vector<32x32xf32>
    %cst_9 = arith.constant dense<0.000000e+00> : vector<2x32xf32>
    %12 = tpu.matmul %1, %11, %cst_9 {dimension_numbers = #tpu.dot_dimension_numbers<[1], [0], [0], [1], [0, 0, 1, 1], [], []>} : vector<2x32xf32>, vector<32x32xf32>, vector<2x32xf32> -> vector<2x32xf32>
    %13 = arith.negf %12 : vector<2x32xf32>
    %14 = math.exp %13 : vector<2x32xf32>
    %cst_10 = arith.constant 1.000000e+00 : f32
    %15 = vector.broadcast %cst_10 : f32 to vector<2x32xf32>
    %16 = arith.addf %15, %14 : vector<2x32xf32>
    %17 = arith.divf %15, %16 : vector<2x32xf32>
    %c0_11 = arith.constant 0 : index
    %c0_12 = arith.constant 0 : index
    %18 = vector.load %arg6[%c0_11, %c0_12] : memref<1x32xf32, #tpu.memory_space<vmem>>, vector<1x32xf32>
    %19 = vector.broadcast %18 : vector<1x32xf32> to vector<2x32xf32>
    %20 = arith.mulf %17, %19 : vector<2x32xf32>
    %21 = vector.shape_cast %20 : vector<2x32xf32> to vector<2x1x32xf32>
    %22 = vector.broadcast %21 : vector<2x1x32xf32> to vector<2x8x32xf32>
    %23 = arith.mulf %10, %22 : vector<2x8x32xf32>
    %cst_13 = arith.constant dense<0.000000e+00> : vector<2x8xf32>
    %24 = vector.multi_reduction <add>, %23, %cst_13 [2] : vector<2x8x32xf32> to vector<2x8xf32>
    %c0_14 = arith.constant 0 : index
    %c0_15 = arith.constant 0 : index
    %25 = memref.load %arg1[%c0_14, %c0_15] : memref<1x1xf32, #tpu.memory_space<smem>>
    %26 = vector.broadcast %25 : f32 to vector<2x8xf32>
    %27 = arith.addf %24, %26 : vector<2x8xf32>
    %28 = arith.negf %27 : vector<2x8xf32>
    %29 = math.exp %28 : vector<2x8xf32>
    %cst_16 = arith.constant 1.000000e+00 : f32
    %30 = vector.broadcast %cst_16 : f32 to vector<2x8xf32>
    %31 = arith.addf %30, %29 : vector<2x8xf32>
    %32 = arith.divf %30, %31 : vector<2x8xf32>
    %cst_17 = arith.constant 0.176776692 : f32
    %33 = vector.broadcast %cst_17 : f32 to vector<2x8xf32>
    %34 = arith.mulf %32, %33 : vector<2x8xf32>
    %cst_18 = arith.constant dense<0xFF800000> : vector<2xf32>
    %35 = vector.multi_reduction <maximumf>, %34, %cst_18 [1] : vector<2x8xf32> to vector<2xf32>
    %36 = vector.shape_cast %35 : vector<2xf32> to vector<2x1xf32>
    %37 = vector.broadcast %36 : vector<2x1xf32> to vector<2x8xf32>
    %38 = arith.subf %34, %37 : vector<2x8xf32>
    %39 = math.exp %38 : vector<2x8xf32>
    %cst_19 = arith.constant dense<0.000000e+00> : vector<2xf32>
    %40 = vector.multi_reduction <add>, %39, %cst_19 [1] : vector<2x8xf32> to vector<2xf32>
    %41 = vector.shape_cast %40 : vector<2xf32> to vector<2x1xf32>
    %42 = vector.broadcast %41 : vector<2x1xf32> to vector<2x8xf32>
    %43 = arith.divf %39, %42 : vector<2x8xf32>
    %44 = vector.shape_cast %43 : vector<2x8xf32> to vector<2x8x1xf32>
    %45 = vector.broadcast %44 : vector<2x8x1xf32> to vector<2x8x32xf32>
    %46 = arith.mulf %45, %0 : vector<2x8x32xf32>
    %cst_20 = arith.constant dense<0.000000e+00> : vector<2x32xf32>
    %47 = vector.multi_reduction <add>, %46, %cst_20 [1] : vector<2x8x32xf32> to vector<2x32xf32>
    %c0_21 = arith.constant 0 : index
    %c0_22 = arith.constant 0 : index
    %48 = vector.load %arg7[%c0_21, %c0_22] : memref<2x32xf32, #tpu.memory_space<vmem>>, vector<2x32xf32>
    tpu.vector_store %arg7[%c0_21, %c0_22], %47 {strides = array<i32>} : memref<2x32xf32, #tpu.memory_space<vmem>>, vector<2x32xf32>,
    return
  }
  func.func @transform_0(%arg0: i32) -> (i32, i32) {
    %c0_i32 = arith.constant 0 : i32
    %c0_i32_0 = arith.constant 0 : i32
    %c0_i32_1 = arith.constant 0 : i32
    return %c0_i32, %c0_i32_0 : i32, i32
  }
  func.func @transform_1(%arg0: i32) -> (i32, i32, i32) {
    %c0_i32 = arith.constant 0 : i32
    %c0_i32_0 = arith.constant 0 : i32
    %c0_i32_1 = arith.constant 0 : i32
    return %arg0, %c0_i32, %c0_i32_0 : i32, i32, i32
  }
  func.func @transform_2(%arg0: i32) -> (i32, i32) {
    %c0_i32 = arith.constant 0 : i32
    %c0_i32_0 = arith.constant 0 : i32
    return %arg0, %c0_i32 : i32, i32
  }
  func.func @transform_3(%arg0: i32) -> (i32, i32) {
    %c0_i32 = arith.constant 0 : i32
    %c0_i32_0 = arith.constant 0 : i32
    %c0_i32_1 = arith.constant 0 : i32
    return %c0_i32, %c0_i32_0 : i32, i32
  }
  func.func @transform_4(%arg0: i32) -> (i32, i32) {
    %c0_i32 = arith.constant 0 : i32
    %c0_i32_0 = arith.constant 0 : i32
    %c0_i32_1 = arith.constant 0 : i32
    return %c0_i32, %c0_i32_0 : i32, i32
  }
  func.func @transform_5(%arg0: i32) -> (i32, i32) {
    %c0_i32 = arith.constant 0 : i32
    %c0_i32_0 = arith.constant 0 : i32
    %c0_i32_1 = arith.constant 0 : i32
    return %c0_i32, %c0_i32_0 : i32, i32
  }
  func.func @transform_6(%arg0: i32) -> (i32, i32) {
    %c0_i32 = arith.constant 0 : i32
    %c0_i32_0 = arith.constant 0 : i32
    return %arg0, %c0_i32 : i32, i32
  }
}

</mosaic_0001>

<bundles_post_ra>
// kernel: m_attention.1
= control target key start
LH: loop header
LB: loop body
LE: loop exit
PB: predicated region body
PF: predicated region fallthrough
CT: control target
= control target key end

     0   :  { %12 = vsyncpa [#allocation4], 0  ;;  %s779_s0 = inlined_call_operand.<no memory space> [shape: f32[1,1], index: 0, kind: input, shape index: {}]   ;;  %s780_s1 = inlined_call_operand.hbm [shape: f32[2,8,32], index: 1, kind: input, shape index: {}]   ;;  %s781_s2 = inlined_call_operand.vmem [shape: f32[2,32], index: 2, kind: input, shape index: {}]   ;;  %s782_s3 = inlined_call_operand.hbm [shape: f32[32,32], index: 3, kind: input, shape index: {}]   ;;  %s783_s4 = inlined_call_operand.hbm [shape: f32[32,32], index: 4, kind: input, shape index: {}]   ;;  %s784_s5 = inlined_call_operand.vmem [shape: f32[1,32], index: 5, kind: input, shape index: {}]   ;;  %s785_s6 = inlined_call_operand.hbm [shape: f32[2,32], index: 6, kind: output, shape index: {}]  }
   0x1   :  { %13 = vsyncpa [#allocation7], 0 }
   0x2   :  { %14 = vsyncpa [#allocation5], 0  ;;  %s628_s21 = smov [#allocation6]   ;;  %s629_s23 = smov [#allocation3]  }
   0x3   :  { %s36_s22 = sshll.u32 %s628_s21, 4  ;;  %s22_s24 = sshll.u32 %s629_s23, 4  ;;  %s37_s22 = int_to_ptr.vmem [resolvable:$true] %s36_s22  ;;  %s674_s24 = int_to_ptr.vmem [resolvable:$true] %s22_s24 }
   0x4   :  { %s534_s27 = scalar_lea.hbm %s782_s3, 512 }
   0x5   :  { %p535_p0 = scmp.ne.s32.totalorder %s782_s3, %s534_s27  ;;  %p538_p1 = scmp.lt.u32.totalorder %s534_s27, %s782_s3 }
   0x7   :  { %p540_p2 = pnand %p538_p1, %p535_p0 }
   0x9   :  { %543 = shalt.err (!%p540_p2)
}
   0xa   :  { %s544_s8 = scalar_lea.vmem %s37_s22, 512  ;;  %p549_p4 = scmp.lt.s32.totalorder %s37_s22, %s37_s22 }
   0xb   :  { %p545_p3 = scmp.ne.s32.totalorder %s37_s22, %s544_s8  ;;  %p550_p5 = scmp.lt.s32.totalorder %s544_s8, %s544_s8 }
   0xd   :  { %p551_p6 = por %p550_p5, %p549_p4 }
   0xf   :  { %p552_p7 = pnand %p551_p6, %p545_p3 }
  0x11   :  { %555 = shalt.err (!%p552_p7)
}
  0x12   :  { %s630_s9 = smov 128   ;;  %s631_s10 = smov 8  }
  0x13   :  { %42 = dma.hbm_to_vmem [thread:$0]  %s782_s3, 512, %s37_s22, [#allocation7], %s630_s9, %s630_s9, %s631_s10  }
  0x14   :  { %s556_s15 = scalar_lea.hbm %s780_s1, 256 }
  0x15   :  { %p557_p8 = scmp.ne.s32.totalorder %s780_s1, %s556_s15  ;;  %p560_p9 = scmp.lt.u32.totalorder %s556_s15, %s780_s1 }
  0x17   :  { %p562_p10 = pnand %p560_p9, %p557_p8 }
  0x19   :  { %565 = shalt.err (!%p562_p10)
}
  0x1a   :  { %s566_s20 = scalar_lea.vmem %s674_s24, 256  ;;  %p571_p12 = scmp.lt.s32.totalorder %s674_s24, %s674_s24 }
  0x1b   :  { %p567_p11 = scmp.ne.s32.totalorder %s674_s24, %s566_s20  ;;  %p572_p13 = scmp.lt.s32.totalorder %s566_s20, %s566_s20 }
  0x1d   :  { %p573_p0 = por %p572_p13, %p571_p12 }
  0x1f   :  { %p574_p1 = pnand %p573_p0, %p567_p11 }
  0x21   :  { %577 = shalt.err (!%p574_p1)
}
  0x22   :  { %28 = dma.hbm_to_vmem [thread:$0]  %s780_s1, 256, %s674_s24, [#allocation4], %s630_s9, %s630_s9, %s631_s10  }
  0x23   :  { %s632_s22 = smov [#allocation8]   ;;  %s578_s27 = scalar_lea.hbm %s783_s4, 512 }
  0x24   :  { %s48_s23 = sshll.u32 %s632_s22, 4  ;;  %p579_p2 = scmp.ne.s32.totalorder %s783_s4, %s578_s27  ;;  %s49_s23 = int_to_ptr.vmem [resolvable:$true] %s48_s23 }
  0x25   :  { %p582_p3 = scmp.lt.u32.totalorder %s578_s27, %s783_s4 }
  0x27   :  { %p584_p4 = pnand %p582_p3, %p579_p2 }
  0x29   :  { %587 = shalt.err (!%p584_p4)
}
  0x2a   :  { %s588_s8 = scalar_lea.vmem %s49_s23, 512  ;;  %p593_p6 = scmp.lt.s32.totalorder %s49_s23, %s49_s23 }
  0x2b   :  { %p589_p5 = scmp.ne.s32.totalorder %s49_s23, %s588_s8  ;;  %p594_p7 = scmp.lt.s32.totalorder %s588_s8, %s588_s8 }
  0x2d   :  { %p595_p8 = por %p594_p7, %p593_p6 }
  0x2f   :  { %p596_p9 = pnand %p595_p8, %p589_p5 }
  0x31   :  { %599 = shalt.err (!%p596_p9)
}
  0x32   :  { %54 = dma.hbm_to_vmem [thread:$0]  %s783_s4, 512, %s49_s23, [#allocation7], %s630_s9, %s630_s9, %s631_s10  }
  0x33   :  { %622 = dma.done.wait [#allocation4], 256  }
  0x34   :  { %623 = vsyncadd [#allocation4], 4294967040 }
  0x35   :  { %624 = dma.done.wait [#allocation7], 1024  }
  0x36   :  { %625 = vsyncadd [#allocation7], 4294966272  ;;  %v633_v0 = vmov 0.0|0.0   ;;  %vm634_vm0 = vmmov 0   ;;  %v635_v1 = vmov 0.0   ;;  %v167_v2 = vld [vmem:[#allocation8] sm:$0xff]  ;;  %v262_v29 = vlaneseq }
  0x37   :  { %487 = vmatprep.subr.bf16.mxu1 %v633_v0  ;;  %476 = vmatprep.mubr.msk.f32.mxu1 %vm634_vm0, %v635_v1  ;;  %v168_v3 = vld [vmem:[#allocation8 + $0x8] sm:$0xff]  ;;  %v169_v4 = vld [vmem:[#allocation8 + $0x10] sm:$0xff]  ;;  %v170_v6 = vld [vmem:[#allocation8 + $0x18] sm:$0xff]  ;;  %vm73_vm1 = vcmask 261120   ;;  %v636_v27 = vmov 1966171168   ;;  %v300_v52 = vstv %s779_s0 }
  0x38   :  { %v488_v5 = vpack.c.bf16 %v168_v3, %v167_v2  ;;  %v69_v7 = vld [vmem:[#allocation6] sm:$0xff]  ;;  %v70_v8 = vld [vmem:[#allocation6 + $0x8] sm:$0xff]  ;;  %v71_v10 = vld [vmem:[#allocation6 + $0x10] sm:$0xff]  ;;  %v491_v12 = vpack.c.bf16 %v170_v6, %v169_v4  ;;  %v260_v28 = vunpack.c.l.s4 %v636_v27  ;;  %v738_v33 = vshrl.u32 %v262_v29, 7  ;;  %s638_s0 = smov [#allocation9]  }
  0x39   :  { %v479_v9 = vpack.c.bf16 %v70_v8, %v69_v7  ;;  %v72_v11 = vld [vmem:[#allocation6 + $0x18] sm:$0xff]  ;;  %v726_v14 = vld [vmem:[#allocation3] sm:$0xff]  ;;  %v320_v63 = vand.u32 127, %v262_v29  ;;  %vm329_vm2 = vcmask 1041409   ;;  %vm332_vm3 = vcmask 58368   ;;  %s427_s12 = sshll.u32 %s638_s0, 4  ;;  %s428_s12 = int_to_ptr.vmem [resolvable:$true] %s427_s12 }
  0x3a   :  { %489 = vmatpush3.bf16.msra.mxu1 %v488_v5  ;;  %v483_v13 = vpack.c.bf16 %v72_v11, %v71_v10  ;;  %465 = vmatprep.mubr.msk.f32.mxu0 %vm73_vm1, %v726_v14  ;;  %v68_v15 = vld [vmem:[%s781_s2] sm:$0x3]  ;;  %v733_v16 = vld [vmem:[#allocation3 + $0x8] sm:$0xff]  ;;  %v261_v32 = vunpack.c.0.s8 %v260_v28  ;;  %v745_v40 = vsub.s32 0, %v738_v33  ;;  %v343_v10 = vsub.s32 1, %v738_v33  ;;  %s600_s13 = scalar_lea.vmem %s428_s12, 32  ;;  %p605_p11 = scmp.lt.s32.totalorder %s428_s12, %s428_s12 }
  0x3b   :  { %490 = vmatprep.subr.bf16.mxu1 %v633_v0  ;;  %480 = vmatprep.subr.bf16.mxu0 %v479_v9  ;;  %v443_v35 = vld [vmem:[%s784_s5] ss:$0 sm:$0xff]  ;;  %v323_v2 = vsub.s32 %v320_v63, %v738_v33  ;;  %vm419_vm4 = vcmask 254976   ;;  %p601_p10 = scmp.ne.s32.totalorder %s428_s12, %s600_s13  ;;  %p606_p12 = scmp.lt.s32.totalorder %s600_s13, %s600_s13 }
  0x3c   :  { %482 = vmatpush3.bf16.msra.mxu0 %v479_v9  ;;  %v264_v36 = vsub.s32 %v261_v32, %v738_v33  ;;  %v637_v9 = vmov 0  }
  0x3d   :  { %484 = vmatprep.subr.bf16.mxu0 %v483_v13  ;;  %505 = vset.pattern.permute.xlu0 %v637_v9  ;;  %p607_p13 = por %p606_p12, %p605_p11 }
  0x3e   :  { %492 = vmatpush3.bf16.msra.mxu1 %v491_v12  ;;  %504 = vset.pattern.permute.xlu1 %v637_v9 }
  0x3f   :  { %p608_p0 = pnand %p607_p13, %p601_p10 }
  0x40   :  { %486 = vmatpush3.bf16.msra.mxu0 %v483_v13 }
  0x41   :  { %477 = vmatmul.mubr.msk.f32.vlgmr.msra.gmra.mrb[0].mxu1 %vm73_vm1, %v68_v15 }
  0x43   :  { %466 = vmatmul.mubr.msk.f32.vlgmr.msra.gmra.mrb[0].mxu0 %vm73_vm1, %v733_v16 }
 0x114   :  { %v240_v17 = vpop.f32.mrb[0].mxu1 }
 0x115   :  { %v442_v18 = vmul.f32 -1.442695, %v240_v17  ;;  %v478_v19 = vpop.f32.mrb[1].mxu1 }
 0x116   :  { %v467_v20 = vpop.f32.mrb[0].mxu0 }
 0x117   :  { %506 = vpow2.f32 %v442_v18  ;;  %v146_v21 = vpop.f32.mrb[1].mxu0  ;;  %v440_v23 = vmul.f32 -1.442695, %v467_v20 }
 0x118   :  { %v439_v22 = vmul.f32 -1.442695, %v146_v21 }
 0x11a   :  { %508 = vpow2.f32 %v439_v22 }
 0x11b   :  { %510 = vpow2.f32 %v440_v23 }
 0x121   :  { %v507_v24 = vpop.eup %506 }
 0x122   :  { %v247_v25 = vadd.f32 1.0, %v507_v24 }
 0x124   :  { %v509_v26 = vpop.eup %508  ;;  %512 = vrcp.f32 %v247_v25 }
 0x125   :  { %v161_v30 = vadd.f32 1.0, %v509_v26  ;;  %v511_v31 = vpop.eup %510 }
 0x126   :  { %v162_v34 = vadd.f32 1.0, %v511_v31 }
 0x127   :  { %514 = vrcp.f32 %v161_v30 }
 0x128   :  { %516 = vrcp.f32 %v162_v34 }
 0x12e   :  { %v513_v37 = vpop.eup %512 }
 0x12f   :  { %v257_v38 = vmul.f32 %v513_v37, %v443_v35 }
 0x131   :  { %v265_v39 = vrot.slane %v257_v38, %v264_v36  ;;  %v515_v43 = vpop.eup %514 }
 0x132   :  { %v517_v48 = vpop.eup %516 }
 0x133   :  { %v273_v41 = vrot.slane %v265_v39, %v264_v36  ;;  %v266_v42 = vcombine.high %v265_v39, %v265_v39 }
 0x135   :  { %v284_v44 = vrot.slane %v273_v41, %v745_v40  ;;  %v280_v45 = vrot.slane %v266_v42, %v264_v36 }
 0x137   :  { %v291_v46 = vmul.f32 %v515_v43, %v284_v44  ;;  %v288_v47 = vrot.slane %v280_v45, %v745_v40 }
 0x139   :  { %v293_v49 = vsel %vm73_vm1, %v291_v46, 0.0  ;;  %v292_v50 = vmul.f32 %v517_v48, %v288_v47 }
 0x13a   :  { %294 = vadd.xlane.f32.xlu0 %v293_v49 }
 0x13b   :  { %v296_v51 = vsel %vm73_vm1, %v292_v50, 0.0 }
 0x13e   :  { %297 = vadd.xlane.f32.xlu0 %v296_v51 }
 0x1c7   :  { %v295_v53 = vpop.xlane.xlu0 %294 }
 0x1c8   :  { %v301_v54 = vadd.f32 %v300_v52, %v295_v53 }
 0x1ca   :  { %v444_v55 = vmul.f32 -1.442695, %v301_v54 }
 0x1cb   :  { %v298_v56 = vpop.xlane.xlu0 %297 }
 0x1cc   :  { %518 = vpow2.f32 %v444_v55  ;;  %v302_v57 = vadd.f32 %v300_v52, %v298_v56 }
 0x1ce   :  { %v445_v58 = vmul.f32 -1.442695, %v302_v57 }
 0x1d0   :  { %520 = vpow2.f32 %v445_v58 }
 0x1d6   :  { %v519_v59 = vpop.eup %518 }
 0x1d7   :  { %v309_v60 = vadd.f32 1.0, %v519_v59 }
 0x1d9   :  { %522 = vrcp.f32 %v309_v60 }
 0x1da   :  { %v521_v61 = vpop.eup %520 }
 0x1db   :  { %v310_v62 = vadd.f32 1.0, %v521_v61 }
 0x1dd   :  { %524 = vrcp.f32 %v310_v62 }
 0x1e3   :  { %v523_v0 = vpop.eup %522 }
 0x1e4   :  { %v315_v1 = vmul.f32 0.17677669, %v523_v0 }
 0x1e6   :  { %v324_v5 = vrot.slane %v315_v1, %v323_v2 }
 0x1e7   :  { %v525_v3 = vpop.eup %524 }
 0x1e8   :  { %v316_v4 = vmul.f32 0.17677669, %v525_v3 }
 0x1ea   :  { %v328_v6 = vrot.slane %v316_v4, %v323_v2 }
 0x1ec   :  { %v330_v7 = vsel %vm329_vm2, %v328_v6, %v324_v5 }
 0x1ed   :  { %v333_v8 = vsel %vm332_vm3, %v330_v7, -inf }
 0x1ee   :  { %334 = vmax.xlane.f32.xlu1 %v333_v8 }
 0x27b   :  { %v335_v11 = vpop.xlane.xlu1 %334 }
 0x27c   :  { %v340_v12 = vrot.slane %v335_v11, %v745_v40  ;;  %v344_v13 = vrot.slane %v335_v11, %v343_v10 }
 0x27e   :  { %v347_v15 = vsub.f32 %v315_v1, %v340_v12  ;;  %v348_v17 = vsub.f32 %v316_v4, %v344_v13 }
 0x280   :  { %v349_v18 = vmul.f32 1.442695, %v347_v15  ;;  %v351_v19 = vmul.f32 1.442695, %v348_v17 }
 0x282   :  { %526 = vpow2.f32 %v349_v18 }
 0x283   :  { %528 = vpow2.f32 %v351_v19 }
 0x28c   :  { %v527_v20 = vpop.eup %526 }
 0x28d   :  { %v529_v21 = vpop.eup %528  ;;  %356 = vperm.xlu1 %504, %v527_v20  }
 0x28e   :  { %359 = vperm.xlu0 %505, %v529_v21  }
 0x30c   :  { %v357_v22 = vpop.permute.xlu1 %356 }
 0x30d   :  { %v360_v23 = vpop.permute.xlu0 %359  ;;  %v364_v24 = vrot.slane %v357_v22, %v323_v2 }
 0x30e   :  { %v368_v25 = vrot.slane %v360_v23, %v323_v2 }
 0x310   :  { %v369_v26 = vsel %vm329_vm2, %v368_v25, %v364_v24 }
 0x311   :  { %v371_v27 = vsel %vm332_vm3, %v369_v26, 0.0 }
 0x312   :  { %372 = vadd.xlane.f32.xlu1 %v371_v27 }
 0x39f   :  { %v373_v28 = vpop.xlane.xlu1 %372 }
 0x3a0   :  { %v378_v29 = vrot.slane %v373_v28, %v745_v40  ;;  %v382_v30 = vrot.slane %v373_v28, %v343_v10 }
 0x3a2   :  { %530 = vrcp.f32 %v378_v29 }
 0x3a3   :  { %532 = vrcp.f32 %v382_v30 }
 0x3ac   :  { %v531_v31 = vpop.eup %530 }
 0x3ad   :  { %v386_v32 = vmul.f32 %v531_v31, %v527_v20  ;;  %v533_v33 = vpop.eup %532 }
 0x3ae   :  { %v388_v34 = vmul.f32 %v533_v33, %v529_v21 }
 0x3af   :  { %391 = vperm.xlu0 %505, %v386_v32  }
 0x3b3   :  { %396 = vperm.xlu0 %505, %v388_v34  }
 0x42e   :  { %v392_v35 = vpop.permute.xlu0 %391 }
 0x42f   :  { %v399_v36 = vmul.f32 %v392_v35, %v726_v14 }
 0x431   :  { %v401_v37 = vsel %vm73_vm1, %v399_v36, 0.0 }
 0x432   :  { %v402_v38 = vrot.slane %v401_v37, 4  ;;  %v397_v39 = vpop.permute.xlu0 %396 }
 0x433   :  { %v400_v41 = vmul.f32 %v397_v39, %v733_v16 }
 0x434   :  { %v403_v42 = vadd.f32 %v402_v38, %v401_v37 }
 0x435   :  { %v408_v40 = vsel %vm73_vm1, %v400_v41, 0.0 }
 0x436   :  { %v404_v43 = vrot.slane %v403_v42, 2  ;;  %v409_v44 = vrot.slane %v408_v40, 4 }
 0x438   :  { %v405_v45 = vadd.f32 %v404_v43, %v403_v42  ;;  %v410_v46 = vadd.f32 %v409_v44, %v408_v40 }
 0x43a   :  { %v411_v47 = vrot.slane %v410_v46, 2  ;;  %v406_v48 = vrot.slane %v405_v45, 1 }
 0x43c   :  { %v412_v49 = vadd.f32 %v411_v47, %v410_v46  ;;  %v407_v14 = vadd.f32 %v406_v48, %v405_v45 }
 0x43e   :  { %v413_v50 = vrot.slane %v412_v49, 1 }
 0x440   :  { %v414_v51 = vadd.f32 %v413_v50, %v412_v49 }
 0x442   :  { %v417_v52 = vsel %vm329_vm2, %v414_v51, %v407_v14 }
 0x443   :  { %420 = vst.msk [vmem:[#allocation9] sm:$0x3] %vm419_vm4, %v417_v52 }
 0x444   :  { %611 = shalt.err (!%p608_p0)
}
 0x445   :  { %s612_s16 = scalar_lea.hbm %s785_s6, 32 }
 0x446   :  { %p613_p1 = scmp.ne.s32.totalorder %s785_s6, %s612_s16  ;;  %p616_p2 = scmp.lt.u32.totalorder %s612_s16, %s785_s6 }
 0x448   :  { %p618_p3 = pnand %p616_p2, %p613_p1 }
 0x44a   :  { %621 = shalt.err (!%p618_p3)
}
 0x44b   :  { %430 = dma.vmem_to_hbm [thread:$0]  %s428_s12, 32, %s785_s6, [#allocation5]  }
 0x44c   :  { %626 = dma.done.wait [#allocation5], 32  }
 0x44d   :  { %627 = vsyncadd [#allocation5], 4294967264 }
 0x44e   :  { %434 = vsyncpa [#allocation4], 1 }
 0x44f   :  { %435 = vsyncpa [#allocation7], 1 }
 0x450   :  { %436 = vsyncpa [#allocation5], 1 }

</bundles_post_ra>
